<compile_context>
chip_gen: v5e
topology: v5e:2x2
jax: 0.10.0
libtpu: 0.0.40
codegen_flags: <defaults>
</compile_context>

<pallas_src>
import math
import numpy as np
import jax
import jax.numpy as jnp
from jax.experimental import pallas as pl
from jax.experimental.pallas import tpu as pltpu


# ----------------------------------------------------------------------------
# Deterministic parameter setup (buffers of the PyTorch module)
# ----------------------------------------------------------------------------
Y_TABLE = np.array(
    [[16, 11, 10, 16, 24, 40, 51, 61],
     [12, 12, 14, 19, 26, 58, 60, 55],
     [14, 13, 16, 24, 40, 57, 69, 56],
     [14, 17, 22, 29, 51, 87, 80, 62],
     [18, 22, 37, 56, 68, 109, 103, 77],
     [24, 35, 55, 64, 81, 104, 113, 92],
     [49, 64, 78, 87, 103, 121, 120, 101],
     [72, 92, 95, 98, 112, 100, 103, 99]], dtype=np.float32).T

# TODO(synk): reference c_table is np.empty (undefined values); using the
# standard JPEG chroma quantization table deterministically instead.
C_TABLE = np.array(
    [[17, 18, 24, 47, 99, 99, 99, 99],
     [18, 21, 26, 66, 99, 99, 99, 99],
     [24, 26, 56, 99, 99, 99, 99, 99],
     [47, 66, 99, 99, 99, 99, 99, 99],
     [99, 99, 99, 99, 99, 99, 99, 99],
     [99, 99, 99, 99, 99, 99, 99, 99],
     [99, 99, 99, 99, 99, 99, 99, 99],
     [99, 99, 99, 99, 99, 99, 99, 99]], dtype=np.float32).T


def make_idct_matrix(table: np.ndarray, factor: float) -> np.ndarray:
    """Fold dequant table, alpha weights, cosine basis and the 0.25 factor into
    a single (64, 64) matrix M such that  out_flat = in_flat @ M + 128
    reproduces:  0.25 * tensordot(in * table * factor * alpha, tensor, 2) + 128
    """
    alpha = np.array([1.0 / np.sqrt(2)] + [1.0] * 7)
    alpha2 = np.outer(alpha, alpha)                       # (x, y)
    T = np.zeros((8, 8), dtype=np.float64)
    for x in range(8):
        for u in range(8):
            T[x, u] = np.cos((2 * u + 1) * x * math.pi / 16)
    scale = table.astype(np.float64) * float(factor) * alpha2      # per-input (x, y)
    M = 0.25 * np.einsum('xy,xu,yv->xyuv', scale, T, T)            # (x, y, u, v)
    return M.reshape(64, 64).astype(np.float32)


def make_idct_matrix_packed(table: np.ndarray, factor: float) -> np.ndarray:
    """block_diag(M, M) so two 8x8 blocks are processed per lane-dense 128-wide
    matmul row (fully populated vregs / unmasked 128-lane stores)."""
    M = make_idct_matrix(table, factor)
    M2 = np.zeros((128, 128), dtype=np.float32)
    M2[:64, :64] = M
    M2[64:, 64:] = M
    return M2


def _upsample_matrix(n_out: int, n_in: int) -> np.ndarray:
    """E[i, i//2] = 1 : exact nearest-neighbour 2x duplication as a matmul."""
    e = np.zeros((n_out, n_in), dtype=np.float32)
    e[np.arange(n_out), np.arange(n_out) // 2] = 1.0
    return e


def _pick_tile(dim: int, target: int, mult: int) -> int:
    """Largest multiple of `mult` that divides `dim` and is <= target,
    falling back to the full dim (full-extent block is always legal)."""
    if dim <= target:
        return dim
    t = (target // mult) * mult
    while t >= mult:
        if dim % t == 0:
            return t
        t -= mult
    return dim


# ----------------------------------------------------------------------------
# Kernel 1: fused dequantization + 8x8 IDCT, row-tiled & lane-dense packed.
#   packed rows: (Rp, 128), each row = two consecutive 8x8 coefficient blocks.
# ----------------------------------------------------------------------------
def _idct_kernel(flat_ref, m_ref, out_ref):
    out_ref[...] = jnp.dot(flat_ref[...], m_ref[...],
                           preferred_element_type=jnp.float32) + 128.0


def dequant_idct(blocks: jax.Array, M128: jax.Array,
                 row_tile: int = 4096) -> jax.Array:
    """blocks: (B, N, 8, 8) -> (B, N, 8, 8) spatial 8x8 tiles."""
    B, N = blocks.shape[0], blocks.shape[1]
    R = B * N
    flat = blocks.reshape(R, 64)
    # Pad so rows pack in pairs and the packed row count is a sublane multiple.
    R2 = ((R + 15) // 16) * 16
    if R2 != R:
        flat = jnp.pad(flat, ((0, R2 - R), (0, 0)))
    Rp = R2 // 2
    packed = flat.reshape(Rp, 128)          # free reshape: contiguous memory

    tr = min(row_tile, Rp)                  # Rp and tr are multiples of 8
    grid = (pl.cdiv(Rp, tr),)

    out = pl.pallas_call(
        _idct_kernel,
        out_shape=jax.ShapeDtypeStruct((Rp, 128), jnp.float32),
        grid_spec=pltpu.PrefetchScalarGridSpec(
            num_scalar_prefetch=0,
            grid=grid,
            in_specs=[pl.BlockSpec((tr, 128), lambda i: (i, 0)),
                      pl.BlockSpec((128, 128), lambda i: (0, 0))],
            out_specs=pl.BlockSpec((tr, 128), lambda i: (i, 0)),
        ),
        compiler_params=pltpu.CompilerParams(
            dimension_semantics=("parallel",),
            vmem_limit_bytes=32 * 1024 * 1024),
    )(packed, M128)

    out = out.reshape(R2, 64)
    if R2 != R:
        out = out[:R]
    return out.reshape(B, N, 8, 8)


# ----------------------------------------------------------------------------
# Glue: block merging (B, N, 8, 8) -> (B, H, W)
# ----------------------------------------------------------------------------
def block_merging(patches: jax.Array, height: int, width: int) -> jax.Array:
    # TODO(synk): this transpose remains XLA glue (one HBM pass per plane);
    # fusing the 8x8 block interleave into the color kernel needs an in-kernel
    # minor-dim relayout (pltpu.einshape) and was left out for lowering safety.
    k = 8
    B = patches.shape[0]
    x = patches.reshape(B, height // k, width // k, k, k)
    x = jnp.transpose(x, (0, 1, 3, 2, 4))
    return x.reshape(B, height, width)


# ----------------------------------------------------------------------------
# Kernel 2: fused 2x chroma upsample + YCbCr -> RGB + clamp, row/col tiled.
#   y block  : (1, TH, TW)         cb/cr blocks : (1, TH/2, TW/2)
#   out block: (1, 3, TH, TW)
# ----------------------------------------------------------------------------
def _color_kernel(y_ref, cb_ref, cr_ref, er_ref, ec_ref, out_ref):
    y = y_ref[0]                                       # (TH, TW)
    er = er_ref[...]                                   # (TH, TH//2) exact 0/1
    ec = ec_ref[...]                                   # (TW//2, TW) exact 0/1
    # Nearest-neighbour 2x upsample on the (otherwise idle) MXU, in VMEM only.
    cb = jnp.dot(er, jnp.dot(cb_ref[0], ec, preferred_element_type=jnp.float32),
                 preferred_element_type=jnp.float32) - 128.0
    cr = jnp.dot(er, jnp.dot(cr_ref[0], ec, preferred_element_type=jnp.float32),
                 preferred_element_type=jnp.float32) - 128.0
    r = y + 1.402 * cr
    g = y - 0.344136 * cb - 0.714136 * cr
    b = y + 1.772 * cb
    out_ref[0, 0] = jnp.clip(r, 0.0, 255.0)
    out_ref[0, 1] = jnp.clip(g, 0.0, 255.0)
    out_ref[0, 2] = jnp.clip(b, 0.0, 255.0)


def ycbcr_to_rgb_clamp(y_img: jax.Array, cb_img: jax.Array, cr_img: jax.Array,
                       tile_h: int = 256, tile_w: int = 512) -> jax.Array:
    B, H, W = y_img.shape
    th = _pick_tile(H, tile_h, 16)     # TH/2 stays a sublane multiple
    tw = _pick_tile(W, tile_w, 256)    # TW and TW/2 stay lane multiples
    er = jnp.asarray(_upsample_matrix(th, th // 2))
    ec = jnp.asarray(_upsample_matrix(tw, tw // 2).T)
    grid = (B, H // th, W // tw)

    return pl.pallas_call(
        _color_kernel,
        out_shape=jax.ShapeDtypeStruct((B, 3, H, W), jnp.float32),
        grid_spec=pltpu.PrefetchScalarGridSpec(
            num_scalar_prefetch=0,
            grid=grid,
            in_specs=[
                pl.BlockSpec((1, th, tw), lambda b, i, j: (b, i, j)),
                pl.BlockSpec((1, th // 2, tw // 2), lambda b, i, j: (b, i, j)),
                pl.BlockSpec((1, th // 2, tw // 2), lambda b, i, j: (b, i, j)),
                pl.BlockSpec((th, th // 2), lambda b, i, j: (0, 0)),
                pl.BlockSpec((tw // 2, tw), lambda b, i, j: (0, 0)),
            ],
            out_specs=pl.BlockSpec((1, 3, th, tw), lambda b, i, j: (b, 0, i, j)),
        ),
        compiler_params=pltpu.CompilerParams(
            dimension_semantics=("parallel", "parallel", "parallel"),
            vmem_limit_bytes=32 * 1024 * 1024),
    )(y_img, cb_img, cr_img, er, ec)


# ----------------------------------------------------------------------------
# Full decompress_jpeg forward
# ----------------------------------------------------------------------------
def _decompress_jpeg_impl(y, cb, cr, height, width, factor):
    M_y = jnp.asarray(make_idct_matrix_packed(Y_TABLE, factor))
    M_c = jnp.asarray(make_idct_matrix_packed(C_TABLE, factor))

    y_sp = dequant_idct(y, M_y)                    # (B, Ny, 8, 8)
    cb_sp = dequant_idct(cb, M_c)                  # (B, Nc, 8, 8)
    cr_sp = dequant_idct(cr, M_c)

    y_img = block_merging(y_sp, height, width)                 # (B, H, W)
    cb_img = block_merging(cb_sp, height // 2, width // 2)     # (B, H/2, W/2)
    cr_img = block_merging(cr_sp, height // 2, width // 2)

    # chroma upsample is fused inside the color kernel (no full-res HBM planes)
    return ycbcr_to_rgb_clamp(y_img, cb_img, cr_img)           # (B, 3, H, W)


decompress_jpeg = jax.jit(_decompress_jpeg_impl,
                          static_argnums=(3, 4, 5))


if __name__ == "__main__":
    B, H, W = 2, 16, 16
    n_y = (H // 8) * (W // 8)          # 4 luma blocks per image
    n_c = (H // 16) * (W // 16)        # 1 chroma block per image

    key = jax.random.PRNGKey(0)
    k1, k2, k3 = jax.random.split(key, 3)
    y = jax.random.normal(k1, (B, n_y, 8, 8), dtype=jnp.float32)
    cb = jax.random.normal(k2, (B, n_c, 8, 8), dtype=jnp.float32)
    cr = jax.random.normal(k3, (B, n_c, 8, 8), dtype=jnp.float32)

    out = decompress_jpeg(y, cb, cr, H, W, 1.0)
    out = jax.block_until_ready(out)

    assert out.shape == (B, 3, H, W), out.shape
    assert out.dtype == jnp.float32
    assert bool(jnp.all(out >= 0.0)) and bool(jnp.all(out <= 255.0))
    print("KERNEL_OK")
</pallas_src>

<mosaic_0001>
module attributes {stable_mosaic.version = 11 : i64} {
  func.func @_idct_kernel(%arg0: i32, %arg1: memref<8x128xf32, #tpu.memory_space<vmem>>, %arg2: memref<128x128xf32, #tpu.memory_space<vmem>>, %arg3: memref<8x128xf32, #tpu.memory_space<vmem>>) attributes {dimension_semantics = [#tpu.dimension_semantics<parallel>], iteration_bounds = array<i64: 1>, scalar_prefetch = 0 : i64, scratch_operands = 0 : i64, tpu.core_type = #tpu.core_type<tc>, window_params = [{transform_indices = @transform_0, window_bounds = array<i64: 8, 128>}, {pipeline_mode = #tpu.pipeline_mode<synchronous>, transform_indices = @transform_1, window_bounds = array<i64: 128, 128>}, {transform_indices = @transform_2, window_bounds = array<i64: 8, 128>}]} {
    %c0 = arith.constant 0 : index
    %c0_0 = arith.constant 0 : index
    %0 = vector.load %arg1[%c0, %c0_0] : memref<8x128xf32, #tpu.memory_space<vmem>>, vector<8x128xf32>
    %c0_1 = arith.constant 0 : index
    %c0_2 = arith.constant 0 : index
    %1 = vector.load %arg2[%c0_1, %c0_2] : memref<128x128xf32, #tpu.memory_space<vmem>>, vector<128x128xf32>
    %cst = arith.constant dense<0.000000e+00> : vector<8x128xf32>
    %2 = tpu.matmul %0, %1, %cst {dimension_numbers = #tpu.dot_dimension_numbers<[1], [0], [0], [1], [0, 0, 1, 1], [], []>} : vector<8x128xf32>, vector<128x128xf32>, vector<8x128xf32> -> vector<8x128xf32>
    %cst_3 = arith.constant 1.280000e+02 : f32
    %3 = vector.broadcast %cst_3 : f32 to vector<8x128xf32>
    %4 = arith.addf %2, %3 : vector<8x128xf32>
    %c0_4 = arith.constant 0 : index
    %c0_5 = arith.constant 0 : index
    %5 = vector.load %arg3[%c0_4, %c0_5] : memref<8x128xf32, #tpu.memory_space<vmem>>, vector<8x128xf32>
    tpu.vector_store %arg3[%c0_4, %c0_5], %4 {strides = array<i32>} : memref<8x128xf32, #tpu.memory_space<vmem>>, vector<8x128xf32>,
    return
  }
  func.func @transform_0(%arg0: i32) -> (i32, i32) {
    %c0_i32 = arith.constant 0 : i32
    %c0_i32_0 = arith.constant 0 : i32
    return %arg0, %c0_i32 : i32, i32
  }
  func.func @transform_1(%arg0: i32) -> (i32, i32) {
    %c0_i32 = arith.constant 0 : i32
    %c0_i32_0 = arith.constant 0 : i32
    %c0_i32_1 = arith.constant 0 : i32
    return %c0_i32, %c0_i32_0 : i32, i32
  }
  func.func @transform_2(%arg0: i32) -> (i32, i32) {
    %c0_i32 = arith.constant 0 : i32
    %c0_i32_0 = arith.constant 0 : i32
    return %arg0, %c0_i32 : i32, i32
  }
}

module attributes {stable_mosaic.version = 11 : i64} {
  func.func @_idct_kernel(%arg0: i32, %arg1: memref<8x128xf32, #tpu.memory_space<vmem>>, %arg2: memref<128x128xf32, #tpu.memory_space<vmem>>, %arg3: memref<8x128xf32, #tpu.memory_space<vmem>>) attributes {dimension_semantics = [#tpu.dimension_semantics<parallel>], iteration_bounds = array<i64: 1>, scalar_prefetch = 0 : i64, scratch_operands = 0 : i64, tpu.core_type = #tpu.core_type<tc>, window_params = [{transform_indices = @transform_0, window_bounds = array<i64: 8, 128>}, {pipeline_mode = #tpu.pipeline_mode<synchronous>, transform_indices = @transform_1, window_bounds = array<i64: 128, 128>}, {transform_indices = @transform_2, window_bounds = array<i64: 8, 128>}]} {
    %c0 = arith.constant 0 : index
    %c0_0 = arith.constant 0 : index
    %0 = vector.load %arg1[%c0, %c0_0] : memref<8x128xf32, #tpu.memory_space<vmem>>, vector<8x128xf32>
    %c0_1 = arith.constant 0 : index
    %c0_2 = arith.constant 0 : index
    %1 = vector.load %arg2[%c0_1, %c0_2] : memref<128x128xf32, #tpu.memory_space<vmem>>, vector<128x128xf32>
    %cst = arith.constant dense<0.000000e+00> : vector<8x128xf32>
    %2 = tpu.matmul %0, %1, %cst {dimension_numbers = #tpu.dot_dimension_numbers<[1], [0], [0], [1], [0, 0, 1, 1], [], []>} : vector<8x128xf32>, vector<128x128xf32>, vector<8x128xf32> -> vector<8x128xf32>
    %cst_3 = arith.constant 1.280000e+02 : f32
    %3 = vector.broadcast %cst_3 : f32 to vector<8x128xf32>
    %4 = arith.addf %2, %3 : vector<8x128xf32>
    %c0_4 = arith.constant 0 : index
    %c0_5 = arith.constant 0 : index
    %5 = vector.load %arg3[%c0_4, %c0_5] : memref<8x128xf32, #tpu.memory_space<vmem>>, vector<8x128xf32>
    tpu.vector_store %arg3[%c0_4, %c0_5], %4 {strides = array<i32>} : memref<8x128xf32, #tpu.memory_space<vmem>>, vector<8x128xf32>,
    return
  }
  func.func @transform_0(%arg0: i32) -> (i32, i32) {
    %c0_i32 = arith.constant 0 : i32
    %c0_i32_0 = arith.constant 0 : i32
    return %arg0, %c0_i32 : i32, i32
  }
  func.func @transform_1(%arg0: i32) -> (i32, i32) {
    %c0_i32 = arith.constant 0 : i32
    %c0_i32_0 = arith.constant 0 : i32
    %c0_i32_1 = arith.constant 0 : i32
    return %c0_i32, %c0_i32_0 : i32, i32
  }
  func.func @transform_2(%arg0: i32) -> (i32, i32) {
    %c0_i32 = arith.constant 0 : i32
    %c0_i32_0 = arith.constant 0 : i32
    return %arg0, %c0_i32 : i32, i32
  }
}

module attributes {stable_mosaic.version = 11 : i64} {
  func.func @_color_kernel(%arg0: i32, %arg1: i32, %arg2: i32, %arg3: memref<1x16x16xf32, #tpu.memory_space<vmem>>, %arg4: memref<1x8x8xf32, #tpu.memory_space<vmem>>, %arg5: memref<1x8x8xf32, #tpu.memory_space<vmem>>, %arg6: memref<16x8xf32, #tpu.memory_space<vmem>>, %arg7: memref<8x16xf32, #tpu.memory_space<vmem>>, %arg8: memref<1x3x16x16xf32, #tpu.memory_space<vmem>>) attributes {dimension_semantics = [#tpu.dimension_semantics<parallel>, #tpu.dimension_semantics<parallel>, #tpu.dimension_semantics<parallel>], iteration_bounds = array<i64: 2, 1, 1>, scalar_prefetch = 0 : i64, scratch_operands = 0 : i64, tpu.core_type = #tpu.core_type<tc>, window_params = [{transform_indices = @transform_0, window_bounds = array<i64: 1, 16, 16>}, {transform_indices = @transform_1, window_bounds = array<i64: 1, 8, 8>}, {transform_indices = @transform_2, window_bounds = array<i64: 1, 8, 8>}, {pipeline_mode = #tpu.pipeline_mode<synchronous>, transform_indices = @transform_3, window_bounds = array<i64: 16, 8>}, {pipeline_mode = #tpu.pipeline_mode<synchronous>, transform_indices = @transform_4, window_bounds = array<i64: 8, 16>}, {transform_indices = @transform_5, window_bounds = array<i64: 1, 3, 16, 16>}]} {
    %c0 = arith.constant 0 : index
    %c0_0 = arith.constant 0 : index
    %c0_1 = arith.constant 0 : index
    %0 = vector.load %arg3[%c0, %c0_0, %c0_1] : memref<1x16x16xf32, #tpu.memory_space<vmem>>, vector<1x16x16xf32>
    %1 = vector.shape_cast %0 : vector<1x16x16xf32> to vector<16x16xf32>
    %c0_2 = arith.constant 0 : index
    %c0_3 = arith.constant 0 : index
    %2 = vector.load %arg6[%c0_2, %c0_3] : memref<16x8xf32, #tpu.memory_space<vmem>>, vector<16x8xf32>
    %c0_4 = arith.constant 0 : index
    %c0_5 = arith.constant 0 : index
    %3 = vector.load %arg7[%c0_4, %c0_5] : memref<8x16xf32, #tpu.memory_space<vmem>>, vector<8x16xf32>
    %c0_6 = arith.constant 0 : index
    %c0_7 = arith.constant 0 : index
    %c0_8 = arith.constant 0 : index
    %4 = vector.load %arg4[%c0_6, %c0_7, %c0_8] : memref<1x8x8xf32, #tpu.memory_space<vmem>>, vector<1x8x8xf32>
    %5 = vector.shape_cast %4 : vector<1x8x8xf32> to vector<8x8xf32>
    %cst = arith.constant dense<0.000000e+00> : vector<8x16xf32>
    %6 = tpu.matmul %5, %3, %cst {dimension_numbers = #tpu.dot_dimension_numbers<[1], [0], [0], [1], [0, 0, 1, 1], [], []>} : vector<8x8xf32>, vector<8x16xf32>, vector<8x16xf32> -> vector<8x16xf32>
    %cst_9 = arith.constant dense<0.000000e+00> : vector<16x16xf32>
    %7 = tpu.matmul %2, %6, %cst_9 {dimension_numbers = #tpu.dot_dimension_numbers<[1], [0], [0], [1], [0, 0, 1, 1], [], []>} : vector<16x8xf32>, vector<8x16xf32>, vector<16x16xf32> -> vector<16x16xf32>
    %cst_10 = arith.constant 1.280000e+02 : f32
    %8 = vector.broadcast %cst_10 : f32 to vector<16x16xf32>
    %9 = arith.subf %7, %8 : vector<16x16xf32>
    %c0_11 = arith.constant 0 : index
    %c0_12 = arith.constant 0 : index
    %c0_13 = arith.constant 0 : index
    %10 = vector.load %arg5[%c0_11, %c0_12, %c0_13] : memref<1x8x8xf32, #tpu.memory_space<vmem>>, vector<1x8x8xf32>
    %11 = vector.shape_cast %10 : vector<1x8x8xf32> to vector<8x8xf32>
    %cst_14 = arith.constant dense<0.000000e+00> : vector<8x16xf32>
    %12 = tpu.matmul %11, %3, %cst_14 {dimension_numbers = #tpu.dot_dimension_numbers<[1], [0], [0], [1], [0, 0, 1, 1], [], []>} : vector<8x8xf32>, vector<8x16xf32>, vector<8x16xf32> -> vector<8x16xf32>
    %cst_15 = arith.constant dense<0.000000e+00> : vector<16x16xf32>
    %13 = tpu.matmul %2, %12, %cst_15 {dimension_numbers = #tpu.dot_dimension_numbers<[1], [0], [0], [1], [0, 0, 1, 1], [], []>} : vector<16x8xf32>, vector<8x16xf32>, vector<16x16xf32> -> vector<16x16xf32>
    %cst_16 = arith.constant 1.280000e+02 : f32
    %14 = vector.broadcast %cst_16 : f32 to vector<16x16xf32>
    %15 = arith.subf %13, %14 : vector<16x16xf32>
    %cst_17 = arith.constant 1.402000e+00 : f32
    %16 = vector.broadcast %cst_17 : f32 to vector<16x16xf32>
    %17 = arith.mulf %16, %15 : vector<16x16xf32>
    %18 = arith.addf %1, %17 : vector<16x16xf32>
    %cst_18 = arith.constant 3.441360e-01 : f32
    %19 = vector.broadcast %cst_18 : f32 to vector<16x16xf32>
    %20 = arith.mulf %19, %9 : vector<16x16xf32>
    %21 = arith.subf %1, %20 : vector<16x16xf32>
    %cst_19 = arith.constant 7.141360e-01 : f32
    %22 = vector.broadcast %cst_19 : f32 to vector<16x16xf32>
    %23 = arith.mulf %22, %15 : vector<16x16xf32>
    %24 = arith.subf %21, %23 : vector<16x16xf32>
    %cst_20 = arith.constant 1.772000e+00 : f32
    %25 = vector.broadcast %cst_20 : f32 to vector<16x16xf32>
    %26 = arith.mulf %25, %9 : vector<16x16xf32>
    %27 = arith.addf %1, %26 : vector<16x16xf32>
    %cst_21 = arith.constant 0.000000e+00 : f32
    %cst_22 = arith.constant 2.550000e+02 : f32
    %28 = vector.broadcast %cst_21 : f32 to vector<16x16xf32>
    %29 = arith.maximumf %28, %18 : vector<16x16xf32>
    %30 = vector.broadcast %cst_22 : f32 to vector<16x16xf32>
    %31 = arith.minimumf %30, %29 : vector<16x16xf32>
    %c0_23 = arith.constant 0 : index
    %c0_24 = arith.constant 0 : index
    %c0_25 = arith.constant 0 : index
    %c0_26 = arith.constant 0 : index
    %32 = vector.load %arg8[%c0_23, %c0_24, %c0_25, %c0_26] : memref<1x3x16x16xf32, #tpu.memory_space<vmem>>, vector<1x1x16x16xf32>
    %33 = vector.shape_cast %32 : vector<1x1x16x16xf32> to vector<16x16xf32>
    %34 = vector.shape_cast %31 : vector<16x16xf32> to vector<1x1x16x16xf32>
    tpu.vector_store %arg8[%c0_23, %c0_24, %c0_25, %c0_26], %34 {strides = array<i32>} : memref<1x3x16x16xf32, #tpu.memory_space<vmem>>, vector<1x1x16x16xf32>,
    %cst_27 = arith.constant 0.000000e+00 : f32
    %cst_28 = arith.constant 2.550000e+02 : f32
    %35 = vector.broadcast %cst_27 : f32 to vector<16x16xf32>
    %36 = arith.maximumf %35, %24 : vector<16x16xf32>
    %37 = vector.broadcast %cst_28 : f32 to vector<16x16xf32>
    %38 = arith.minimumf %37, %36 : vector<16x16xf32>
    %c0_29 = arith.constant 0 : index
    %c1 = arith.constant 1 : index
    %c0_30 = arith.constant 0 : index
    %c0_31 = arith.constant 0 : index
    %39 = vector.load %arg8[%c0_29, %c1, %c0_30, %c0_31] : memref<1x3x16x16xf32, #tpu.memory_space<vmem>>, vector<1x1x16x16xf32>
    %40 = vector.shape_cast %39 : vector<1x1x16x16xf32> to vector<16x16xf32>
    %41 = vector.shape_cast %38 : vector<16x16xf32> to vector<1x1x16x16xf32>
    tpu.vector_store %arg8[%c0_29, %c1, %c0_30, %c0_31], %41 {strides = array<i32>} : memref<1x3x16x16xf32, #tpu.memory_space<vmem>>, vector<1x1x16x16xf32>,
    %cst_32 = arith.constant 0.000000e+00 : f32
    %cst_33 = arith.constant 2.550000e+02 : f32
    %42 = vector.broadcast %cst_32 : f32 to vector<16x16xf32>
    %43 = arith.maximumf %42, %27 : vector<16x16xf32>
    %44 = vector.broadcast %cst_33 : f32 to vector<16x16xf32>
    %45 = arith.minimumf %44, %43 : vector<16x16xf32>
    %c0_34 = arith.constant 0 : index
    %c2 = arith.constant 2 : index
    %c0_35 = arith.constant 0 : index
    %c0_36 = arith.constant 0 : index
    %46 = vector.load %arg8[%c0_34, %c2, %c0_35, %c0_36] : memref<1x3x16x16xf32, #tpu.memory_space<vmem>>, vector<1x1x16x16xf32>
    %47 = vector.shape_cast %46 : vector<1x1x16x16xf32> to vector<16x16xf32>
    %48 = vector.shape_cast %45 : vector<16x16xf32> to vector<1x1x16x16xf32>
    tpu.vector_store %arg8[%c0_34, %c2, %c0_35, %c0_36], %48 {strides = array<i32>} : memref<1x3x16x16xf32, #tpu.memory_space<vmem>>, vector<1x1x16x16xf32>,
    return
  }
  func.func @transform_0(%arg0: i32, %arg1: i32, %arg2: i32) -> (i32, i32, i32) {
    %c0_i32 = arith.constant 0 : i32
    return %arg0, %arg1, %arg2 : i32, i32, i32
  }
  func.func @transform_1(%arg0: i32, %arg1: i32, %arg2: i32) -> (i32, i32, i32) {
    %c0_i32 = arith.constant 0 : i32
    return %arg0, %arg1, %arg2 : i32, i32, i32
  }
  func.func @transform_2(%arg0: i32, %arg1: i32, %arg2: i32) -> (i32, i32, i32) {
    %c0_i32 = arith.constant 0 : i32
    return %arg0, %arg1, %arg2 : i32, i32, i32
  }
  func.func @transform_3(%arg0: i32, %arg1: i32, %arg2: i32) -> (i32, i32) {
    %c0_i32 = arith.constant 0 : i32
    %c0_i32_0 = arith.constant 0 : i32
    %c0_i32_1 = arith.constant 0 : i32
    return %c0_i32, %c0_i32_0 : i32, i32
  }
  func.func @transform_4(%arg0: i32, %arg1: i32, %arg2: i32) -> (i32, i32) {
    %c0_i32 = arith.constant 0 : i32
    %c0_i32_0 = arith.constant 0 : i32
    %c0_i32_1 = arith.constant 0 : i32
    return %c0_i32, %c0_i32_0 : i32, i32
  }
  func.func @transform_5(%arg0: i32, %arg1: i32, %arg2: i32) -> (i32, i32, i32, i32) {
    %c0_i32 = arith.constant 0 : i32
    %c0_i32_0 = arith.constant 0 : i32
    return %arg0, %c0_i32, %arg1, %arg2 : i32, i32, i32, i32
  }
}

</mosaic_0001>

<bundles_post_ra>
// kernel: _decompress_jpeg_impl.6
= control target key start
LH: loop header
LB: loop body
LE: loop exit
PB: predicated region body
PF: predicated region fallthrough
CT: control target
= control target key end

     0   :  { %s122_s1 = inlined_call_operand.vmem [shape: f32[128,128], index: 1, kind: input, shape index: {}]   ;;  %s123_s0 = inlined_call_operand.vmem [shape: f32[8,128], index: 0, kind: input, shape index: {}]   ;;  %s124_s2 = inlined_call_operand.vmem [shape: f32[8,128], index: 2, kind: output, shape index: {}]  }
   0x1   :  { %v27_v0 = vld [vmem:[%s122_s1 + $0x78] sm:$0xff]  ;;  %v26_v1 = vld [vmem:[%s122_s1 + $0x70] sm:$0xff]  ;;  %v25_v2 = vld [vmem:[%s122_s1 + $0x68] sm:$0xff] }
   0x2   :  { %28 = vmatpush.msra.mxu0 %v27_v0  ;;  %v24_v3 = vld [vmem:[%s122_s1 + $0x60] sm:$0xff]  ;;  %v23_v4 = vld [vmem:[%s122_s1 + $0x58] sm:$0xff]  ;;  %v22_v5 = vld [vmem:[%s122_s1 + $0x50] sm:$0xff] }
   0x3   :  { %v21_v6 = vld [vmem:[%s122_s1 + $0x48] sm:$0xff]  ;;  %v20_v7 = vld [vmem:[%s122_s1 + $0x40] sm:$0xff]  ;;  %v19_v8 = vld [vmem:[%s122_s1 + $0x38] sm:$0xff] }
   0x4   :  { %29 = vmatpush.msra.mxu0 %v26_v1  ;;  %v18_v9 = vld [vmem:[%s122_s1 + $0x30] sm:$0xff]  ;;  %v17_v10 = vld [vmem:[%s122_s1 + $0x28] sm:$0xff]  ;;  %v16_v11 = vld [vmem:[%s122_s1 + $0x20] sm:$0xff] }
   0x5   :  { %v15_v12 = vld [vmem:[%s122_s1 + $0x18] sm:$0xff]  ;;  %v14_v13 = vld [vmem:[%s122_s1 + $0x10] sm:$0xff]  ;;  %v13_v14 = vld [vmem:[%s122_s1 + $0x8] sm:$0xff] }
   0x6   :  { %30 = vmatpush.msra.mxu0 %v25_v2  ;;  %v12_v15 = vld [vmem:[%s122_s1] sm:$0xff] }
   0x7   :  { %v11_v16 = vld [vmem:[%s123_s0] sm:$0xff] }
   0x8   :  { %31 = vmatpush.msra.mxu0 %v24_v3 }
   0xa   :  { %32 = vmatpush.msra.mxu0 %v23_v4 }
   0xc   :  { %33 = vmatpush.msra.mxu0 %v22_v5 }
   0xe   :  { %34 = vmatpush.msra.mxu0 %v21_v6 }
  0x10   :  { %35 = vmatpush.msra.mxu0 %v20_v7 }
  0x12   :  { %36 = vmatpush.msra.mxu0 %v19_v8 }
  0x14   :  { %37 = vmatpush.msra.mxu0 %v18_v9 }
  0x16   :  { %38 = vmatpush.msra.mxu0 %v17_v10 }
  0x18   :  { %39 = vmatpush.msra.mxu0 %v16_v11 }
  0x1a   :  { %40 = vmatpush.msra.mxu0 %v15_v12 }
  0x1c   :  { %41 = vmatpush.msra.mxu0 %v14_v13 }
  0x1e   :  { %42 = vmatpush.msra.mxu0 %v13_v14 }
  0x20   :  { %43 = vmatpush.msra.mxu0 %v12_v15 }
  0x21   :  { %44 = vmatmul.f32.vlgmr.msra.gmra.mxu0 %v11_v16 }
  0x9e   :  { %v45_v17 = vpop.f32.mrf.mxu0 }
  0x9f   :  { %v46_v18 = vadd.f32 128.0, %v45_v17 }
  0xa1   :  { %48 = vst [vmem:[%s124_s2] sm:$0xff] %v46_v18 }

// kernel: _decompress_jpeg_impl.4
= control target key start
LH: loop header
LB: loop body
LE: loop exit
PB: predicated region body
PF: predicated region fallthrough
CT: control target
= control target key end

     0   :  { %7 = vsyncpa [#allocation3], 0  ;;  %s99_s12 = smov [#allocation2]   ;;  %s100_s14 = smov 128   ;;  %s126_s0 = inlined_call_operand.vmem [shape: f32[8,128], index: 0, kind: input, shape index: {}]   ;;  %s127_s1 = inlined_call_operand.hbm [shape: f32[128,128], index: 1, kind: input, shape index: {}]   ;;  %s128_s2 = inlined_call_operand.vmem [shape: f32[8,128], index: 2, kind: output, shape index: {}]  }
   0x1   :  { %s14_s11 = sshll.u32 %s127_s1, 4  ;;  %s16_s13 = sshll.u32 %s99_s12, 4  ;;  %s15_s11 = int_to_ptr.hbm [resolvable:$true] %s14_s11  ;;  %s17_s13 = int_to_ptr.vmem [resolvable:$true] %s16_s13 }
   0x2   :  { %s101_s15 = smov 8  }
   0x3   :  { %22 = dma.hbm_to_vmem [thread:$0]  %s15_s11, 2048, %s17_s13, [#allocation3], %s100_s14, %s100_s14, %s101_s15  }
   0x4   :  { %97 = dma.done.wait [#allocation3], 2048  }
   0x5   :  { %98 = vsyncadd [#allocation3], 4294965248  ;;  %v43_v0 = vld [vmem:[#allocation2 + $0x78] sm:$0xff]  ;;  %v42_v1 = vld [vmem:[#allocation2 + $0x70] sm:$0xff] }
   0x6   :  { %44 = vmatpush.msra.mxu0 %v43_v0  ;;  %v41_v2 = vld [vmem:[#allocation2 + $0x68] sm:$0xff]  ;;  %v40_v3 = vld [vmem:[#allocation2 + $0x60] sm:$0xff]  ;;  %v39_v4 = vld [vmem:[#allocation2 + $0x58] sm:$0xff] }
   0x7   :  { %v38_v5 = vld [vmem:[#allocation2 + $0x50] sm:$0xff]  ;;  %v37_v6 = vld [vmem:[#allocation2 + $0x48] sm:$0xff]  ;;  %v36_v7 = vld [vmem:[#allocation2 + $0x40] sm:$0xff] }
   0x8   :  { %45 = vmatpush.msra.mxu0 %v42_v1  ;;  %v35_v8 = vld [vmem:[#allocation2 + $0x38] sm:$0xff]  ;;  %v34_v9 = vld [vmem:[#allocation2 + $0x30] sm:$0xff]  ;;  %v33_v10 = vld [vmem:[#allocation2 + $0x28] sm:$0xff] }
   0x9   :  { %v32_v11 = vld [vmem:[#allocation2 + $0x20] sm:$0xff]  ;;  %v31_v12 = vld [vmem:[#allocation2 + $0x18] sm:$0xff]  ;;  %v30_v13 = vld [vmem:[#allocation2 + $0x10] sm:$0xff] }
   0xa   :  { %46 = vmatpush.msra.mxu0 %v41_v2  ;;  %v29_v14 = vld [vmem:[#allocation2 + $0x8] sm:$0xff]  ;;  %v28_v15 = vld [vmem:[#allocation2] sm:$0xff] }
   0xb   :  { %v27_v16 = vld [vmem:[%s126_s0] sm:$0xff] }
   0xc   :  { %47 = vmatpush.msra.mxu0 %v40_v3 }
   0xe   :  { %48 = vmatpush.msra.mxu0 %v39_v4 }
  0x10   :  { %49 = vmatpush.msra.mxu0 %v38_v5 }
  0x12   :  { %50 = vmatpush.msra.mxu0 %v37_v6 }
  0x14   :  { %51 = vmatpush.msra.mxu0 %v36_v7 }
  0x16   :  { %52 = vmatpush.msra.mxu0 %v35_v8 }
  0x18   :  { %53 = vmatpush.msra.mxu0 %v34_v9 }
  0x1a   :  { %54 = vmatpush.msra.mxu0 %v33_v10 }
  0x1c   :  { %55 = vmatpush.msra.mxu0 %v32_v11 }
  0x1e   :  { %56 = vmatpush.msra.mxu0 %v31_v12 }
  0x20   :  { %57 = vmatpush.msra.mxu0 %v30_v13 }
  0x22   :  { %58 = vmatpush.msra.mxu0 %v29_v14 }
  0x24   :  { %59 = vmatpush.msra.mxu0 %v28_v15 }
  0x25   :  { %60 = vmatmul.f32.vlgmr.msra.gmra.mxu0 %v27_v16 }
  0xa2   :  { %v61_v17 = vpop.f32.mrf.mxu0 }
  0xa3   :  { %v62_v18 = vadd.f32 128.0, %v61_v17 }
  0xa5   :  { %64 = vst [vmem:[%s128_s2] sm:$0xff] %v62_v18 }
  0xa6   :  { %69 = vsyncpa [#allocation3], 1 }

// kernel: _decompress_jpeg_impl.7
= control target key start
LH: loop header
LB: loop body
LE: loop exit
PB: predicated region body
PF: predicated region fallthrough
CT: control target
= control target key end

     0   :  { %10 = vsyncpa [#allocation3], 0  ;;  %s975_s0 = inlined_call_operand.vmem [shape: f32[2,16,16], index: 0, kind: input, shape index: {}]   ;;  %s976_s1 = inlined_call_operand.vmem [shape: f32[2,8,8], index: 1, kind: input, shape index: {}]   ;;  %s977_s2 = inlined_call_operand.vmem [shape: f32[2,8,8], index: 2, kind: input, shape index: {}]   ;;  %s978_s3 = inlined_call_operand.vmem [shape: f32[16,8], index: 3, kind: input, shape index: {}]   ;;  %s979_s4 = inlined_call_operand.vmem [shape: f32[8,16], index: 4, kind: input, shape index: {}]   ;;  %s980_s5 = inlined_call_operand.hbm [shape: f32[2,3,16,16], index: 5, kind: output, shape index: {}]  }
   0x1   :  { %12 = vsyncpa [#allocation3 + $0x1], 0  ;;  %s838_s18 = smov 0   ;;  %s840_s19 = smov 0  }
   0x2   :  { %s842_s20 = smov 0   ;;  %s844_s21 = smov 0  }
   0x3   :  { %s846_s22 = smov 0   ;;  %s848_s23 = smov 0  }
   0x4 LB: > { %s640_s24 = sadd.s32 4294967295, %s804_s23   ;;  %s641_s25 = sadd.s32 4294967294, %s804_s23   ;;  %s804_s23 = sphi %s848_s23, %s18_s23   ;;  %s800_s22 = sphi %s846_s22, %s987_s22   ;;  %s796_s21 = sphi %s844_s21, %s986_s21   ;;  %s792_s20 = sphi %s842_s20, %s985_s20   ;;  %s788_s19 = sphi %s840_s19, %s984_s19   ;;  %s784_s18 = sphi %s838_s18, %s983_s18  }
   0x5   : > { %s37_s26 = sadd.s32 1, %s800_s22  ;;  %s180_s27 = sadd.s32 1, %s792_s20 }
   0x6   : > { %p39_p0 = scmp.ge.s32.totalorder %s37_s26, 2  ;;  %p190_p1 = scmp.ne.s32.totalorder %s792_s20, %s788_s19 }
   0x7   : > { %p191_p2 = scmp.eq.s32.totalorder %s640_s24, 1  ;;  %p196_p3 = scmp.ne.s32.totalorder %s788_s19, %s784_s18 }
   0x8   : > { %s989_s26 = smov (%p39_p0, %s37_s26), 0  ;;  %p197_p5 = scmp.eq.s32.totalorder %s641_s25, 1 }
   0x9   : > { %p878_p4 = por %p191_p2, %p190_p1  ;;  %s173_s29 = ssub.s32 %s800_s22, %s989_s26 }
   0xa   : > { %p644_p6 = scmp.ge.s32.totalorder %s804_s23, 1  ;;  %p178_p7 = scmp.eq.s32.totalorder %s173_s29, 0 }
   0xb   : > { %p885_p8 = por %p197_p5, %p196_p3  ;;  %p263_p9 = scmp.lt.s32.totalorder %s804_s23, 3 }
   0xc   : > { %s891_s6 = scalar_select %p178_p7, %s792_s20, %s180_s27  }
   0xd   : > { %p264_p10 = pnand %p644_p6, %p263_p9 }
   0xe   : > { %p319_p11 = scmp.lt.s32.totalorder (!%p264_p10), %s796_s21, 1  ;;  %s315_s11 = sand.u32 (!%p264_p10), 1, %s788_s19  }
   0xf   : > { %267 = sbr.rel (%p264_p10) target bundleno = 313 (0x139), region = 40  ;;  %s500_s24 = scalar_lea.sflag (!%p264_p10), [#allocation3], %s315_s11 }
  0x10   : > { %s667_s12 = smul.u32 (!%p264_p10), 48, %s315_s11  ;;  %s746_s8 = scalar_lea.hbm (!%p264_p10), %s980_s5, 96 }
  0x14   : > { %v356_v0 = vld [vmem:[%s979_s4] sm:$0xff]  ;;  %s320_s9 = scalar_select %p319_p11, %s796_s21, 1  ;;  %vm358_vm0 = vcmask 64512   ;;  %v355_v6 = vld [vmem:[%s978_s3 + $0x8] sm:$0xff]  ;;  %vm482_vm1 = vcmask 130048  }
  0x15   : > { %432 = vmatpush.msra.mxu2 %v356_v0  ;;  %377 = vmatpush.msra.mxu0 %v356_v0  ;;  %v354_v4 = vld [vmem:[%s978_s3] sm:$0xff] }
  0x16   : > { %s647_s10 = sshll.u32 %s320_s9, 3  ;;  %s666_s29 = sshll.u32 %s320_s9, 4 }
  0x17   : > { %s350_s13 = scalar_lea.vmem %s977_s2, %s647_s10  ;;  %s340_s16 = scalar_lea.vmem %s976_s1, %s647_s10 }
  0x18   : > { %v413_v1 = vld [vmem:[%s350_s13] sm:$0xff]  ;;  %s329_s10 = scalar_lea.vmem %s975_s0, %s666_s29  ;;  %s922_s9 = scalar_lea.vmem [#allocation2], %s667_s12 }
  0x19   : > { %654 = vmatmul.msk.f32.vlgmr.msra.gmra.mxu2 %vm358_vm0, %v413_v1  ;;  %v357_v2 = vld [vmem:[%s340_s16] sm:$0xff]  ;;  %v353_v17 = vld [vmem:[%s329_s10 + $0x8] sm:$0xff]  ;;  %s668_s13 = smul.u32 48, %s796_s21  ;;  %s515_s21 = sshll.u32 %s922_s9, 4  ;;  %s516_s21 = int_to_ptr.vmem [resolvable:$true] %s515_s21 }
  0x1a   : > { %649 = vmatmul.msk.f32.vlgmr.msra.gmra.mxu0 %vm358_vm0, %v357_v2  ;;  %v352_v9 = vld [vmem:[%s329_s10] sm:$0xff] }
  0x1b   : > { %s514_s16 = scalar_lea.hbm %s980_s5, %s668_s13 }
  0x1c   : > { %s517_s17 = sshll.u32 %s514_s16, 4  ;;  %s518_s17 = int_to_ptr.hbm [resolvable:$true] %s517_s17 }
  0x1d   : > { %s740_s25 = sshra.s32 %s518_s17, 4  ;;  %s741_s25 = int_to_ptr.hbm [resolvable:$true] %s740_s25 }
  0x1e   : > { %s742_s27 = scalar_lea.hbm %s741_s25, 48  ;;  %p747_p1 = scmp.lt.s32.totalorder %s741_s25, %s980_s5 }
  0x1f   : > { %p743_p12 = scmp.ne.s32.totalorder %s741_s25, %s742_s27  ;;  %p748_p2 = scmp.lt.s32.totalorder %s746_s8, %s742_s27 }
  0x21   : > { %p744_p13 = pnand %p743_p12, %p878_p4  ;;  %p749_p3 = por %p748_p2, %p747_p1 }
  0x23   : > { %p745_p0 = pneg %p744_p13 }
  0x25   : > { %p750_p5 = pnand %p749_p3, %p745_p0 }
  0x97   : > { %v379_v3 = vpop.f32.mrf.mxu0 }
  0x98   : > { %403 = vmatpush.msra.mxu1 %v379_v3 }
  0x99   : > { %650 = vmatmul.msk.f32.vlgmr.msra.gmra.mxu1 %vm358_vm0, %v354_v4 }
  0x9c   : > { %v434_v5 = vpop.f32.mrf.mxu2 }
  0x9d   : > { %452 = vmatpush.msra.mxu3 %v434_v5 }
  0x9e   : > { %655 = vmatmul.msk.f32.vlgmr.msra.gmra.mxu3 %vm358_vm0, %v354_v4 }
  0xa1   : > { %651 = vmatmul.msk.f32.gmra.mxu1 %vm358_vm0, %v355_v6 }
  0xa6   : > { %656 = vmatmul.msk.f32.gmra.mxu3 %vm358_vm0, %v355_v6 }
 0x116   : > { %v405_v7 = vpop.f32.mrf.mxu1 }
 0x117   : > { %v652_v8 = vadd.f32 -128.0, %v405_v7 }
 0x119   : > { %v474_v10 = vmul.f32 1.772, %v652_v8  ;;  %v466_v13 = vmul.f32 0.344136, %v652_v8 }
 0x11b   : > { %v476_v11 = vadd.f32 %v474_v10, %v352_v9  ;;  %v468_v20 = vsub.f32 %v352_v9, %v466_v13 }
 0x11d   : > { %v492_v12 = vmax.f32 %v476_v11, 0.0 }
 0x11e   : > { %v408_v14 = vpop.f32.mrf.mxu1 }
 0x11f   : > { %v494_v15 = vmin.f32 %v492_v12, 255.0  ;;  %v653_v16 = vadd.f32 -128.0, %v408_v14 }
 0x121   : > { %661 = vst.msk [vmem:[%s922_s9 + $0x20] sm:$0xff] %vm482_vm1, %v494_v15  ;;  %v454_v18 = vpop.f32.mrf.mxu3  ;;  %v475_v19 = vmul.f32 1.772, %v653_v16  ;;  %v467_v28 = vmul.f32 0.344136, %v653_v16 }
 0x122   : > { %v657_v21 = vadd.f32 -128.0, %v454_v18 }
 0x123   : > { %v477_v22 = vadd.f32 %v475_v19, %v353_v17  ;;  %v469_v35 = vsub.f32 %v353_v17, %v467_v28 }
 0x124   : > { %v462_v23 = vmul.f32 1.402, %v657_v21  ;;  %v470_v24 = vmul.f32 0.714136, %v657_v21 }
 0x125   : > { %v493_v25 = vmax.f32 %v477_v22, 0.0 }
 0x126   : > { %v464_v26 = vadd.f32 %v462_v23, %v352_v9  ;;  %v472_v27 = vsub.f32 %v468_v20, %v470_v24 }
 0x127   : > { %v495_v29 = vmin.f32 %v493_v25, 255.0 }
 0x128   : > { %v478_v30 = vmax.f32 %v464_v26, 0.0  ;;  %v485_v31 = vmax.f32 %v472_v27, 0.0 }
 0x129   : > { %662 = vst.msk [vmem:[%s922_s9 + $0x28] sm:$0xff] %vm482_vm1, %v495_v29  ;;  %v457_v32 = vpop.f32.mrf.mxu3 }
 0x12a   : > { %v480_v33 = vmin.f32 %v478_v30, 255.0  ;;  %v487_v34 = vmin.f32 %v485_v31, 255.0  ;;  %v658_v36 = vadd.f32 -128.0, %v457_v32 }
 0x12c   : > { %483 = vst.msk [vmem:[%s922_s9] sm:$0xff] %vm482_vm1, %v480_v33  ;;  %v463_v37 = vmul.f32 1.402, %v658_v36  ;;  %v471_v38 = vmul.f32 0.714136, %v658_v36 }
 0x12d   : > { %659 = vst.msk [vmem:[%s922_s9 + $0x10] sm:$0xff] %vm482_vm1, %v487_v34 }
 0x12e   : > { %v465_v39 = vadd.f32 %v463_v37, %v353_v17  ;;  %v473_v40 = vsub.f32 %v469_v35, %v471_v38 }
 0x130   : > { %v479_v41 = vmax.f32 %v465_v39, 0.0  ;;  %v486_v42 = vmax.f32 %v473_v40, 0.0 }
 0x132   : > { %v481_v43 = vmin.f32 %v479_v41, 255.0  ;;  %v488_v44 = vmin.f32 %v486_v42, 255.0 }
 0x134   : > { %484 = vst.msk [vmem:[%s922_s9 + $0x8] sm:$0xff] %vm482_vm1, %v481_v43 }
 0x135   : > { %660 = vst.msk [vmem:[%s922_s9 + $0x18] sm:$0xff] %vm482_vm1, %v488_v44 }
 0x136   : > { %753 = shalt.err (!%p750_p5)
}
 0x137   : > { %s806_s11 = smov 128   ;;  %s807_s9 = smov 8  }
 0x138   : > { %669 = dma.vmem_to_hbm [thread:$0]  (%p878_p4), %s516_s21, 768, %s518_s17, %s500_s24, %s806_s11, %s806_s11, %s807_s9  }
 0x139 PF: > { %p675_p6 = scmp.ge.s32.totalorder %s804_s23, 2  ;;  %s532_s13 = sand.u32 1, %s784_s18  }
 0x13a   : > { %s533_s14 = scalar_lea.sflag [#allocation3], %s532_s13 }
 0x13b   : > { %p672_p7 = pnand %p675_p6, %p885_p8 }
 0x13d   : > { %p673_p9 = pneg %p672_p7 }
 0x13f   : > { %779 = dma.done.wait (%p673_p9), %s533_s14, 768  }
 0x140   : > { %781 = vsyncadd (%p673_p9), %s533_s14, 4294966528  ;;  %s18_s23 = sadd.s32 1, %s804_s23   ;;  %s983_s18 = smov %s788_s19 }
 0x141   : > { %p15_p10 = scmp.ge.s32.totalorder %s18_s23, 4   ;;  %s984_s19 = smov %s792_s20 }
 0x142   : > { %s985_s20 = smov %s891_s6  ;;  %s986_s21 = smov %s800_s22 }
 0x143   : > { %s987_s22 = smov %s989_s26  ;;  %17 = sbr.rel (!%p15_p10) target bundleno = 4 (0x4), region = 83 }
 0x148   :  { %539 = vsyncpa [#allocation3], 1 }
 0x149   :  { %541 = vsyncpa [#allocation3 + $0x1], 1 }

</bundles_post_ra>
